<compile_context>
chip_gen: v7x
topology: tpu7x:2x2x1
jax: 0.10.0
libtpu: 0.0.40
codegen_flags: <defaults>
</compile_context>

<pallas_src>
import jax
import jax.numpy as jnp
import numpy as np
from jax.experimental import pallas as pl
from jax.experimental.pallas import tpu as pltpu

# ---- small synthetic config (consistent with GemmaConfig; num_heads*head_dim == hidden) ----
B = 2
S = 8
T = B * S                                 # 16 flattened tokens
HIDDEN = 64
N_HEADS = 4
N_KV_HEADS = 2
HEAD_DIM = 16
INTER = 128
EPS = 1e-6
THETA = 10000.0
GROUPS = N_HEADS // N_KV_HEADS
ROT_HALF = HEAD_DIM // 2
Q_W = N_HEADS * HEAD_DIM                  # 64
KV_W = N_KV_HEADS * HEAD_DIM              # 32
QK_W = Q_W + KV_W                         # 96   (q|k block that gets RoPE)
V_OFF = QK_W                              # 96
ROT_OFF = QK_W + KV_W                     # 128  (start of rotate_half(q|k) block)
PROJ_W = ROT_OFF + QK_W                   # 224  (fused projection width)


def _gelu_tanh(x):
    # PyTorch F.gelu(..., approximate='tanh')
    return 0.5 * x * (1.0 + jnp.tanh(0.7978845608028654 * (x + 0.044715 * x * x * x)))


# ----------------------------- fused decoder-layer kernel -----------------------------

def _decoder_layer_kernel(x_ref, rope_ref, mask_ref, ln_ref,
                          wqkv_ref, wo_ref, wgu_ref, bgu_ref, wd_ref, bd_ref,
                          o_ref):
    f32 = jnp.float32
    bf16 = jnp.bfloat16

    x = x_ref[...].astype(f32)                           # (T, H) residual stream

    # ---- input RMSNorm ----
    var = jnp.mean(x * x, axis=-1, keepdims=True)
    h = x * jax.lax.rsqrt(var + EPS) * ln_ref[0:1, :]

    # ---- fused QKV (+ rotate_half(QK)) projection: one (T, 224) matmul ----
    # Column layout: [q(64) | k(32) | v(32) | rot_half(q)(64) | rot_half(k)(32)];
    # 1/sqrt(head_dim) is pre-folded into the q and rot_half(q) columns.
    qkv = jnp.dot(h.astype(bf16), wqkv_ref[...], preferred_element_type=f32)   # (T, 224)

    cos_qk = rope_ref[0]                                 # (T, 96)
    sin_qk = rope_ref[1]                                 # (T, 96)
    # RoPE: q_embed = q*cos + rotate_half(q)*sin — pure VPU FMAs, no slicing/rolling.
    qk = qkv[:, :QK_W] * cos_qk + qkv[:, ROT_OFF:PROJ_W] * sin_qk               # (T, 96)
    q = qk[:, :Q_W].astype(bf16)                         # (T, 64)
    k = qk[:, Q_W:QK_W].astype(bf16)                     # (T, 32)
    v = qkv[:, V_OFF:ROT_OFF].astype(bf16)               # (T, 32)

    mask = mask_ref[...]                                 # (T, T) causal + batch-block-diag
    contract_last = (((1,), (1,)), ((), ()))             # q @ k^T without materializing k.T

    # Attention + out-projection accumulated per head directly into the residual.
    x2 = x
    for hh in range(N_HEADS):
        kv = hh // GROUPS                                # repeat_kv via index
        q_h = q[:, hh * HEAD_DIM:(hh + 1) * HEAD_DIM]
        k_h = k[:, kv * HEAD_DIM:(kv + 1) * HEAD_DIM]
        v_h = v[:, kv * HEAD_DIM:(kv + 1) * HEAD_DIM]
        s = jax.lax.dot_general(q_h, k_h, contract_last,
                                preferred_element_type=f32) + mask             # (T, T)
        m = jnp.max(s, axis=-1, keepdims=True)
        p = jnp.exp(s - m)
        l = jnp.sum(p, axis=-1, keepdims=True)
        o_h = jnp.dot(p.astype(bf16), v_h, preferred_element_type=f32)         # (T, D)
        o_h = o_h * pl.reciprocal(l, approx=True)
        wo_h = wo_ref[hh * HEAD_DIM:(hh + 1) * HEAD_DIM, :]                    # sublane slice (D, H)
        x2 = x2 + jnp.dot(o_h.astype(bf16), wo_h, preferred_element_type=f32)

    # ---- post-attention RMSNorm ----
    var2 = jnp.mean(x2 * x2, axis=-1, keepdims=True)
    h2 = x2 * jax.lax.rsqrt(var2 + EPS) * ln_ref[1:2, :]

    # ---- fused gate/up MLP (256 lanes) + tanh-GELU + down-proj + residual ----
    gu = jnp.dot(h2.astype(bf16), wgu_ref[...], preferred_element_type=f32) + bgu_ref[...]
    g = _gelu_tanh(gu[:, :INTER])
    u = gu[:, INTER:]
    z = (g * u).astype(bf16)
    out = jnp.dot(z, wd_ref[...], preferred_element_type=f32) + bd_ref[...] + x2
    o_ref[...] = out.astype(o_ref.dtype)


# ----------------------------- wrappers -----------------------------

def _rotate_half_cols(w_t, n_heads):
    """Return W' such that x @ W' == rotate_half(x @ w_t) (per-head column permute + sign)."""
    blocks = []
    for hh in range(n_heads):
        blk = w_t[:, hh * HEAD_DIM:(hh + 1) * HEAD_DIM]
        blocks.append(jnp.concatenate([-blk[:, ROT_HALF:], blk[:, :ROT_HALF]], axis=1))
    return jnp.concatenate(blocks, axis=1)


def prepare_decoder_params(p):
    """One-time layout prep: fuse + transpose weights to (in, out), cast matmul weights
    to bf16, fold 1/sqrt(head_dim) into Wq, and bake rotate_half into extra columns."""
    scale = HEAD_DIM ** -0.5
    wq_t = p["wq"].T * scale                                               # (H, 64)
    wk_t = p["wk"].T                                                       # (H, 32)
    wv_t = p["wv"].T                                                       # (H, 32)
    wqkv = jnp.concatenate(
        [wq_t, wk_t, wv_t,
         _rotate_half_cols(wq_t, N_HEADS), _rotate_half_cols(wk_t, N_KV_HEADS)],
        axis=1)                                                            # (H, 224)
    wgu = jnp.concatenate([p["wg"], p["wu"]], axis=0).T                    # (H, 256)
    return {
        "ln": jnp.stack([p["ln_in"], p["ln_post"]], axis=0).astype(jnp.float32),   # (2, H)
        "wqkv": wqkv.astype(jnp.bfloat16),
        "wo": p["wo"].T.astype(jnp.bfloat16),                              # (H, H)
        "wgu": wgu.astype(jnp.bfloat16),
        "bgu": jnp.concatenate([p["bg"], p["bu"]]).reshape(1, 2 * INTER).astype(jnp.float32),
        "wd": p["wd"].T.astype(jnp.bfloat16),                              # (INTER, H)
        "bd": p["bd"].reshape(1, HIDDEN).astype(jnp.float32),
    }


def gemma_decoder_layer(attention_mask, hidden_states, position_ids, prep):
    b, s, hd = hidden_states.shape
    t = b * s

    # Flatten tokens: all matmuls see M = B*S rows; the whole layer is one grid step.
    x2d = hidden_states.reshape(t, hd)

    # RoPE tables replicated across the head-contiguous q|k column layout (XLA-side glue).
    inv_freq = 1.0 / (THETA ** (jnp.arange(0, HEAD_DIM, 2, dtype=jnp.float32) / HEAD_DIM))
    pos = position_ids.reshape(t).astype(jnp.float32)
    freqs = pos[:, None] * inv_freq[None, :]                               # (T, D/2)
    reps = QK_W // ROT_HALF                                                # 12
    cos_qk = jnp.tile(jnp.cos(freqs), (1, reps))                           # (T, 96)
    sin_qk = jnp.tile(jnp.sin(freqs), (1, reps))                           # (T, 96)
    rope_cs = jnp.stack([cos_qk, sin_qk], axis=0)                          # (2, T, 96)

    # Batch-block-diagonal mask over the flattened (T, T) score matrix.
    am = attention_mask[:, 0].astype(jnp.float32)                          # (B, S, S)
    same_b = jnp.arange(b)[:, None] == jnp.arange(b)[None, :]              # (B, B)
    mask_bd = jnp.where(same_b[:, None, :, None], am[:, :, None, :],
                        jnp.float32(-1e9)).reshape(t, t)                   # (T, T)

    def full(shape):
        n = len(shape)
        return pl.BlockSpec(shape, lambda i: (0,) * n)

    out2d = pl.pallas_call(
        _decoder_layer_kernel,
        out_shape=jax.ShapeDtypeStruct((t, hd), hidden_states.dtype),
        grid=(1,),
        in_specs=[
            full((t, hd)),              # x (flattened tokens)
            full((2, t, QK_W)),         # cos/sin (packed)
            full((t, t)),               # block-diagonal causal mask
            full((2, hd)),              # ln_in / ln_post (packed)
            full((hd, PROJ_W)),         # fused [q|k|v|rot(q)|rot(k)] weights
            full((hd, hd)),             # wo
            full((hd, 2 * INTER)),      # wgu
            full((1, 2 * INTER)),       # bgu
            full((INTER, hd)),          # wd
            full((1, hd)),              # bd
        ],
        out_specs=full((t, hd)),
        compiler_params=pltpu.CompilerParams(dimension_semantics=("arbitrary",)),
    )(x2d, rope_cs, mask_bd, prep["ln"], prep["wqkv"], prep["wo"],
      prep["wgu"], prep["bgu"], prep["wd"], prep["bd"])

    return out2d.reshape(b, s, hd)


# ----------------------------- Pure-JAX reference -----------------------------

def reference_decoder_layer(attention_mask, hidden_states, position_ids, p):
    def rn(x, w):
        var = jnp.mean(x.astype(jnp.float32) ** 2, axis=-1, keepdims=True)
        return x * jax.lax.rsqrt(var + EPS) * w

    def rotate_half(x):
        half = x.shape[-1] // 2
        return jnp.concatenate([-x[..., half:], x[..., :half]], axis=-1)

    b, s, hd = hidden_states.shape
    inv_freq = 1.0 / (THETA ** (jnp.arange(0, HEAD_DIM, 2, dtype=jnp.float32) / HEAD_DIM))
    freqs = position_ids.astype(jnp.float32)[:, :, None] * inv_freq[None, None, :]
    emb = jnp.concatenate([freqs, freqs], axis=-1)
    cos = jnp.cos(emb)[:, None, :, :]
    sin = jnp.sin(emb)[:, None, :, :]

    residual = hidden_states
    h = rn(hidden_states, p["ln_in"])
    q = h @ p["wq"].T
    k = h @ p["wk"].T
    v = h @ p["wv"].T
    q = q.reshape(b, s, N_HEADS, HEAD_DIM).transpose(0, 2, 1, 3)
    k = k.reshape(b, s, N_KV_HEADS, HEAD_DIM).transpose(0, 2, 1, 3)
    v = v.reshape(b, s, N_KV_HEADS, HEAD_DIM).transpose(0, 2, 1, 3)
    q = q * cos + rotate_half(q) * sin
    k = k * cos + rotate_half(k) * sin
    k = jnp.repeat(k, GROUPS, axis=1)
    v = jnp.repeat(v, GROUPS, axis=1)
    scores = q @ k.transpose(0, 1, 3, 2) * (HEAD_DIM ** -0.5) + attention_mask
    w_attn = jax.nn.softmax(scores, axis=-1)
    o = w_attn @ v
    o = o.transpose(0, 2, 1, 3).reshape(b, s, hd)
    o = o @ p["wo"].T
    x = o + residual

    residual = x
    h = rn(x, p["ln_post"])
    g = h @ p["wg"].T + p["bg"]
    g = _gelu_tanh(g)
    u = h @ p["wu"].T + p["bu"]
    z = (g * u) @ p["wd"].T + p["bd"]
    return z + residual


# ----------------------------- Main -----------------------------

if __name__ == "__main__":
    key = jax.random.PRNGKey(0)
    ks = jax.random.split(key, 16)

    def init(k_, shape, scale=0.05):
        return jax.random.normal(k_, shape, jnp.float32) * scale

    params = {
        "wq": init(ks[0], (N_HEADS * HEAD_DIM, HIDDEN)),
        "wk": init(ks[1], (N_KV_HEADS * HEAD_DIM, HIDDEN)),
        "wv": init(ks[2], (N_KV_HEADS * HEAD_DIM, HIDDEN)),
        "wo": init(ks[3], (HIDDEN, HIDDEN)),
        "wg": init(ks[4], (INTER, HIDDEN)),
        "bg": init(ks[5], (INTER,)),
        "wu": init(ks[6], (INTER, HIDDEN)),
        "bu": init(ks[7], (INTER,)),
        "wd": init(ks[8], (HIDDEN, INTER)),
        "bd": init(ks[9], (HIDDEN,)),
        "ln_in": 1.0 + init(ks[10], (HIDDEN,)),
        "ln_post": 1.0 + init(ks[11], (HIDDEN,)),
    }

    hidden_states = jax.random.normal(ks[12], (B, S, HIDDEN), jnp.float32)
    position_ids = jnp.broadcast_to(jnp.arange(S, dtype=jnp.int32)[None, :], (B, S))
    causal = jnp.tril(jnp.ones((S, S), jnp.bool_))
    mask_2d = jnp.where(causal, 0.0, -1e9).astype(jnp.float32)
    attention_mask = jnp.tile(mask_2d[None, None, :, :], (B, 1, 1, 1))

    prep = prepare_decoder_params(params)
    out = gemma_decoder_layer(attention_mask, hidden_states, position_ids, prep)
    out = jax.block_until_ready(out)

    ref = reference_decoder_layer(attention_mask, hidden_states, position_ids, params)
    np.testing.assert_allclose(np.asarray(out), np.asarray(ref), rtol=2e-2, atol=2e-2)

    print("KERNEL_OK")
</pallas_src>

<mosaic_0001>
module attributes {stable_mosaic.version = 11 : i64} {
  func.func @_decoder_layer_kernel(%arg0: i32, %arg1: memref<16x64xf32, #tpu.memory_space<vmem>>, %arg2: memref<2x16x96xf32, #tpu.memory_space<vmem>>, %arg3: memref<16x16xf32, #tpu.memory_space<vmem>>, %arg4: memref<2x64xf32, #tpu.memory_space<vmem>>, %arg5: memref<64x224xbf16, #tpu.memory_space<vmem>>, %arg6: memref<64x64xbf16, #tpu.memory_space<vmem>>, %arg7: memref<64x256xbf16, #tpu.memory_space<vmem>>, %arg8: memref<1x256xf32, #tpu.memory_space<vmem>>, %arg9: memref<128x64xbf16, #tpu.memory_space<vmem>>, %arg10: memref<1x64xf32, #tpu.memory_space<vmem>>, %arg11: memref<16x64xf32, #tpu.memory_space<vmem>>) attributes {dimension_semantics = [#tpu.dimension_semantics<arbitrary>], iteration_bounds = array<i64: 1>, scalar_prefetch = 0 : i64, scratch_operands = 0 : i64, tpu.core_type = #tpu.core_type<tc>, window_params = [{pipeline_mode = #tpu.pipeline_mode<synchronous>, transform_indices = @transform_0, window_bounds = array<i64: 16, 64>}, {pipeline_mode = #tpu.pipeline_mode<synchronous>, transform_indices = @transform_1, window_bounds = array<i64: 2, 16, 96>}, {pipeline_mode = #tpu.pipeline_mode<synchronous>, transform_indices = @transform_2, window_bounds = array<i64: 16, 16>}, {pipeline_mode = #tpu.pipeline_mode<synchronous>, transform_indices = @transform_3, window_bounds = array<i64: 2, 64>}, {pipeline_mode = #tpu.pipeline_mode<synchronous>, transform_indices = @transform_4, window_bounds = array<i64: 64, 224>}, {pipeline_mode = #tpu.pipeline_mode<synchronous>, transform_indices = @transform_5, window_bounds = array<i64: 64, 64>}, {pipeline_mode = #tpu.pipeline_mode<synchronous>, transform_indices = @transform_6, window_bounds = array<i64: 64, 256>}, {pipeline_mode = #tpu.pipeline_mode<synchronous>, transform_indices = @transform_7, window_bounds = array<i64: 1, 256>}, {pipeline_mode = #tpu.pipeline_mode<synchronous>, transform_indices = @transform_8, window_bounds = array<i64: 128, 64>}, {pipeline_mode = #tpu.pipeline_mode<synchronous>, transform_indices = @transform_9, window_bounds = array<i64: 1, 64>}, {pipeline_mode = #tpu.pipeline_mode<synchronous>, transform_indices = @transform_10, window_bounds = array<i64: 16, 64>}]} {
    %c0 = arith.constant 0 : index
    %c0_0 = arith.constant 0 : index
    %0 = vector.load %arg1[%c0, %c0_0] : memref<16x64xf32, #tpu.memory_space<vmem>>, vector<16x64xf32>
    %1 = arith.mulf %0, %0 : vector<16x64xf32>
    %cst = arith.constant dense<0.000000e+00> : vector<16xf32>
    %2 = vector.multi_reduction <add>, %1, %cst [1] : vector<16x64xf32> to vector<16xf32>
    %3 = vector.shape_cast %2 : vector<16xf32> to vector<16x1xf32>
    %cst_1 = arith.constant 6.400000e+01 : f32
    %4 = vector.broadcast %cst_1 : f32 to vector<16x1xf32>
    %5 = arith.divf %3, %4 : vector<16x1xf32>
    %cst_2 = arith.constant 9.99999997E-7 : f32
    %6 = vector.broadcast %cst_2 : f32 to vector<16x1xf32>
    %7 = arith.addf %5, %6 : vector<16x1xf32>
    %8 = math.rsqrt %7 : vector<16x1xf32>
    %9 = vector.broadcast %8 : vector<16x1xf32> to vector<16x64xf32>
    %10 = arith.mulf %0, %9 : vector<16x64xf32>
    %c0_3 = arith.constant 0 : index
    %c0_4 = arith.constant 0 : index
    %11 = vector.load %arg4[%c0_3, %c0_4] : memref<2x64xf32, #tpu.memory_space<vmem>>, vector<1x64xf32>
    %12 = vector.broadcast %11 : vector<1x64xf32> to vector<16x64xf32>
    %13 = arith.mulf %10, %12 : vector<16x64xf32>
    %14 = arith.truncf %13 : vector<16x64xf32> to vector<16x64xbf16>
    %c0_5 = arith.constant 0 : index
    %c0_6 = arith.constant 0 : index
    %15 = vector.load %arg5[%c0_5, %c0_6] : memref<64x224xbf16, #tpu.memory_space<vmem>>, vector<64x224xbf16>
    %cst_7 = arith.constant dense<0.000000e+00> : vector<16x224xf32>
    %16 = tpu.matmul %14, %15, %cst_7 {dimension_numbers = #tpu.dot_dimension_numbers<[1], [0], [0], [1], [0, 0, 1, 1], [], []>} : vector<16x64xbf16>, vector<64x224xbf16>, vector<16x224xf32> -> vector<16x224xf32>
    %c0_8 = arith.constant 0 : index
    %c0_9 = arith.constant 0 : index
    %c0_10 = arith.constant 0 : index
    %17 = vector.load %arg2[%c0_8, %c0_9, %c0_10] : memref<2x16x96xf32, #tpu.memory_space<vmem>>, vector<1x16x96xf32>
    %18 = vector.shape_cast %17 : vector<1x16x96xf32> to vector<16x96xf32>
    %c1 = arith.constant 1 : index
    %c0_11 = arith.constant 0 : index
    %c0_12 = arith.constant 0 : index
    %19 = vector.load %arg2[%c1, %c0_11, %c0_12] : memref<2x16x96xf32, #tpu.memory_space<vmem>>, vector<1x16x96xf32>
    %20 = vector.shape_cast %19 : vector<1x16x96xf32> to vector<16x96xf32>
    %21 = vector.extract_strided_slice %16 {offsets = [0, 0], sizes = [16, 96], strides = [1, 1]} : vector<16x224xf32> to vector<16x96xf32>
    %22 = arith.mulf %21, %18 : vector<16x96xf32>
    %23 = vector.extract_strided_slice %16 {offsets = [0, 128], sizes = [16, 96], strides = [1, 1]} : vector<16x224xf32> to vector<16x96xf32>
    %24 = arith.mulf %23, %20 : vector<16x96xf32>
    %25 = arith.addf %22, %24 : vector<16x96xf32>
    %26 = vector.extract_strided_slice %25 {offsets = [0, 0], sizes = [16, 64], strides = [1, 1]} : vector<16x96xf32> to vector<16x64xf32>
    %27 = arith.truncf %26 : vector<16x64xf32> to vector<16x64xbf16>
    %28 = vector.extract_strided_slice %25 {offsets = [0, 64], sizes = [16, 32], strides = [1, 1]} : vector<16x96xf32> to vector<16x32xf32>
    %29 = arith.truncf %28 : vector<16x32xf32> to vector<16x32xbf16>
    %30 = vector.extract_strided_slice %16 {offsets = [0, 96], sizes = [16, 32], strides = [1, 1]} : vector<16x224xf32> to vector<16x32xf32>
    %31 = arith.truncf %30 : vector<16x32xf32> to vector<16x32xbf16>
    %c0_13 = arith.constant 0 : index
    %c0_14 = arith.constant 0 : index
    %32 = vector.load %arg3[%c0_13, %c0_14] : memref<16x16xf32, #tpu.memory_space<vmem>>, vector<16x16xf32>
    %33 = vector.extract_strided_slice %27 {offsets = [0, 0], sizes = [16, 16], strides = [1, 1]} : vector<16x64xbf16> to vector<16x16xbf16>
    %34 = vector.extract_strided_slice %29 {offsets = [0, 0], sizes = [16, 16], strides = [1, 1]} : vector<16x32xbf16> to vector<16x16xbf16>
    %35 = vector.extract_strided_slice %31 {offsets = [0, 0], sizes = [16, 16], strides = [1, 1]} : vector<16x32xbf16> to vector<16x16xbf16>
    %cst_15 = arith.constant dense<0.000000e+00> : vector<16x16xf32>
    %36 = tpu.matmul %33, %34, %cst_15 {dimension_numbers = #tpu.dot_dimension_numbers<[1], [1], [0], [0], [0, 0, 1, 0], [], []>} : vector<16x16xbf16>, vector<16x16xbf16>, vector<16x16xf32> -> vector<16x16xf32>
    %37 = arith.addf %36, %32 : vector<16x16xf32>
    %cst_16 = arith.constant dense<0xFF800000> : vector<16xf32>
    %38 = vector.multi_reduction <maximumf>, %37, %cst_16 [1] : vector<16x16xf32> to vector<16xf32>
    %39 = vector.shape_cast %38 : vector<16xf32> to vector<16x1xf32>
    %40 = vector.broadcast %39 : vector<16x1xf32> to vector<16x16xf32>
    %41 = arith.subf %37, %40 : vector<16x16xf32>
    %42 = math.exp %41 : vector<16x16xf32>
    %cst_17 = arith.constant dense<0.000000e+00> : vector<16xf32>
    %43 = vector.multi_reduction <add>, %42, %cst_17 [1] : vector<16x16xf32> to vector<16xf32>
    %44 = vector.shape_cast %43 : vector<16xf32> to vector<16x1xf32>
    %45 = arith.truncf %42 : vector<16x16xf32> to vector<16x16xbf16>
    %cst_18 = arith.constant dense<0.000000e+00> : vector<16x16xf32>
    %46 = tpu.matmul %45, %35, %cst_18 {dimension_numbers = #tpu.dot_dimension_numbers<[1], [0], [0], [1], [0, 0, 1, 1], [], []>} : vector<16x16xbf16>, vector<16x16xbf16>, vector<16x16xf32> -> vector<16x16xf32>
    %47 = tpu.reciprocal %44 {approx = true} : vector<16x1xf32> -> vector<16x1xf32>
    %48 = vector.broadcast %47 : vector<16x1xf32> to vector<16x16xf32>
    %49 = arith.mulf %46, %48 : vector<16x16xf32>
    %c0_19 = arith.constant 0 : index
    %c0_20 = arith.constant 0 : index
    %50 = vector.load %arg6[%c0_19, %c0_20] : memref<64x64xbf16, #tpu.memory_space<vmem>>, vector<16x64xbf16>
    %51 = arith.truncf %49 : vector<16x16xf32> to vector<16x16xbf16>
    %cst_21 = arith.constant dense<0.000000e+00> : vector<16x64xf32>
    %52 = tpu.matmul %51, %50, %cst_21 {dimension_numbers = #tpu.dot_dimension_numbers<[1], [0], [0], [1], [0, 0, 1, 1], [], []>} : vector<16x16xbf16>, vector<16x64xbf16>, vector<16x64xf32> -> vector<16x64xf32>
    %53 = arith.addf %0, %52 : vector<16x64xf32>
    %54 = vector.extract_strided_slice %27 {offsets = [0, 16], sizes = [16, 16], strides = [1, 1]} : vector<16x64xbf16> to vector<16x16xbf16>
    %55 = vector.extract_strided_slice %29 {offsets = [0, 0], sizes = [16, 16], strides = [1, 1]} : vector<16x32xbf16> to vector<16x16xbf16>
    %56 = vector.extract_strided_slice %31 {offsets = [0, 0], sizes = [16, 16], strides = [1, 1]} : vector<16x32xbf16> to vector<16x16xbf16>
    %cst_22 = arith.constant dense<0.000000e+00> : vector<16x16xf32>
    %57 = tpu.matmul %54, %55, %cst_22 {dimension_numbers = #tpu.dot_dimension_numbers<[1], [1], [0], [0], [0, 0, 1, 0], [], []>} : vector<16x16xbf16>, vector<16x16xbf16>, vector<16x16xf32> -> vector<16x16xf32>
    %58 = arith.addf %57, %32 : vector<16x16xf32>
    %cst_23 = arith.constant dense<0xFF800000> : vector<16xf32>
    %59 = vector.multi_reduction <maximumf>, %58, %cst_23 [1] : vector<16x16xf32> to vector<16xf32>
    %60 = vector.shape_cast %59 : vector<16xf32> to vector<16x1xf32>
    %61 = vector.broadcast %60 : vector<16x1xf32> to vector<16x16xf32>
    %62 = arith.subf %58, %61 : vector<16x16xf32>
    %63 = math.exp %62 : vector<16x16xf32>
    %cst_24 = arith.constant dense<0.000000e+00> : vector<16xf32>
    %64 = vector.multi_reduction <add>, %63, %cst_24 [1] : vector<16x16xf32> to vector<16xf32>
    %65 = vector.shape_cast %64 : vector<16xf32> to vector<16x1xf32>
    %66 = arith.truncf %63 : vector<16x16xf32> to vector<16x16xbf16>
    %cst_25 = arith.constant dense<0.000000e+00> : vector<16x16xf32>
    %67 = tpu.matmul %66, %56, %cst_25 {dimension_numbers = #tpu.dot_dimension_numbers<[1], [0], [0], [1], [0, 0, 1, 1], [], []>} : vector<16x16xbf16>, vector<16x16xbf16>, vector<16x16xf32> -> vector<16x16xf32>
    %68 = tpu.reciprocal %65 {approx = true} : vector<16x1xf32> -> vector<16x1xf32>
    %69 = vector.broadcast %68 : vector<16x1xf32> to vector<16x16xf32>
    %70 = arith.mulf %67, %69 : vector<16x16xf32>
    %c16 = arith.constant 16 : index
    %c0_26 = arith.constant 0 : index
    %71 = vector.load %arg6[%c16, %c0_26] : memref<64x64xbf16, #tpu.memory_space<vmem>>, vector<16x64xbf16>
    %72 = arith.truncf %70 : vector<16x16xf32> to vector<16x16xbf16>
    %cst_27 = arith.constant dense<0.000000e+00> : vector<16x64xf32>
    %73 = tpu.matmul %72, %71, %cst_27 {dimension_numbers = #tpu.dot_dimension_numbers<[1], [0], [0], [1], [0, 0, 1, 1], [], []>} : vector<16x16xbf16>, vector<16x64xbf16>, vector<16x64xf32> -> vector<16x64xf32>
    %74 = arith.addf %53, %73 : vector<16x64xf32>
    %75 = vector.extract_strided_slice %27 {offsets = [0, 32], sizes = [16, 16], strides = [1, 1]} : vector<16x64xbf16> to vector<16x16xbf16>
    %76 = vector.extract_strided_slice %29 {offsets = [0, 16], sizes = [16, 16], strides = [1, 1]} : vector<16x32xbf16> to vector<16x16xbf16>
    %77 = vector.extract_strided_slice %31 {offsets = [0, 16], sizes = [16, 16], strides = [1, 1]} : vector<16x32xbf16> to vector<16x16xbf16>
    %cst_28 = arith.constant dense<0.000000e+00> : vector<16x16xf32>
    %78 = tpu.matmul %75, %76, %cst_28 {dimension_numbers = #tpu.dot_dimension_numbers<[1], [1], [0], [0], [0, 0, 1, 0], [], []>} : vector<16x16xbf16>, vector<16x16xbf16>, vector<16x16xf32> -> vector<16x16xf32>
    %79 = arith.addf %78, %32 : vector<16x16xf32>
    %cst_29 = arith.constant dense<0xFF800000> : vector<16xf32>
    %80 = vector.multi_reduction <maximumf>, %79, %cst_29 [1] : vector<16x16xf32> to vector<16xf32>
    %81 = vector.shape_cast %80 : vector<16xf32> to vector<16x1xf32>
    %82 = vector.broadcast %81 : vector<16x1xf32> to vector<16x16xf32>
    %83 = arith.subf %79, %82 : vector<16x16xf32>
    %84 = math.exp %83 : vector<16x16xf32>
    %cst_30 = arith.constant dense<0.000000e+00> : vector<16xf32>
    %85 = vector.multi_reduction <add>, %84, %cst_30 [1] : vector<16x16xf32> to vector<16xf32>
    %86 = vector.shape_cast %85 : vector<16xf32> to vector<16x1xf32>
    %87 = arith.truncf %84 : vector<16x16xf32> to vector<16x16xbf16>
    %cst_31 = arith.constant dense<0.000000e+00> : vector<16x16xf32>
    %88 = tpu.matmul %87, %77, %cst_31 {dimension_numbers = #tpu.dot_dimension_numbers<[1], [0], [0], [1], [0, 0, 1, 1], [], []>} : vector<16x16xbf16>, vector<16x16xbf16>, vector<16x16xf32> -> vector<16x16xf32>
    %89 = tpu.reciprocal %86 {approx = true} : vector<16x1xf32> -> vector<16x1xf32>
    %90 = vector.broadcast %89 : vector<16x1xf32> to vector<16x16xf32>
    %91 = arith.mulf %88, %90 : vector<16x16xf32>
    %c32 = arith.constant 32 : index
    %c0_32 = arith.constant 0 : index
    %92 = vector.load %arg6[%c32, %c0_32] : memref<64x64xbf16, #tpu.memory_space<vmem>>, vector<16x64xbf16>
    %93 = arith.truncf %91 : vector<16x16xf32> to vector<16x16xbf16>
    %cst_33 = arith.constant dense<0.000000e+00> : vector<16x64xf32>
    %94 = tpu.matmul %93, %92, %cst_33 {dimension_numbers = #tpu.dot_dimension_numbers<[1], [0], [0], [1], [0, 0, 1, 1], [], []>} : vector<16x16xbf16>, vector<16x64xbf16>, vector<16x64xf32> -> vector<16x64xf32>
    %95 = arith.addf %74, %94 : vector<16x64xf32>
    %96 = vector.extract_strided_slice %27 {offsets = [0, 48], sizes = [16, 16], strides = [1, 1]} : vector<16x64xbf16> to vector<16x16xbf16>
    %97 = vector.extract_strided_slice %29 {offsets = [0, 16], sizes = [16, 16], strides = [1, 1]} : vector<16x32xbf16> to vector<16x16xbf16>
    %98 = vector.extract_strided_slice %31 {offsets = [0, 16], sizes = [16, 16], strides = [1, 1]} : vector<16x32xbf16> to vector<16x16xbf16>
    %cst_34 = arith.constant dense<0.000000e+00> : vector<16x16xf32>
    %99 = tpu.matmul %96, %97, %cst_34 {dimension_numbers = #tpu.dot_dimension_numbers<[1], [1], [0], [0], [0, 0, 1, 0], [], []>} : vector<16x16xbf16>, vector<16x16xbf16>, vector<16x16xf32> -> vector<16x16xf32>
    %100 = arith.addf %99, %32 : vector<16x16xf32>
    %cst_35 = arith.constant dense<0xFF800000> : vector<16xf32>
    %101 = vector.multi_reduction <maximumf>, %100, %cst_35 [1] : vector<16x16xf32> to vector<16xf32>
    %102 = vector.shape_cast %101 : vector<16xf32> to vector<16x1xf32>
    %103 = vector.broadcast %102 : vector<16x1xf32> to vector<16x16xf32>
    %104 = arith.subf %100, %103 : vector<16x16xf32>
    %105 = math.exp %104 : vector<16x16xf32>
    %cst_36 = arith.constant dense<0.000000e+00> : vector<16xf32>
    %106 = vector.multi_reduction <add>, %105, %cst_36 [1] : vector<16x16xf32> to vector<16xf32>
    %107 = vector.shape_cast %106 : vector<16xf32> to vector<16x1xf32>
    %108 = arith.truncf %105 : vector<16x16xf32> to vector<16x16xbf16>
    %cst_37 = arith.constant dense<0.000000e+00> : vector<16x16xf32>
    %109 = tpu.matmul %108, %98, %cst_37 {dimension_numbers = #tpu.dot_dimension_numbers<[1], [0], [0], [1], [0, 0, 1, 1], [], []>} : vector<16x16xbf16>, vector<16x16xbf16>, vector<16x16xf32> -> vector<16x16xf32>
    %110 = tpu.reciprocal %107 {approx = true} : vector<16x1xf32> -> vector<16x1xf32>
    %111 = vector.broadcast %110 : vector<16x1xf32> to vector<16x16xf32>
    %112 = arith.mulf %109, %111 : vector<16x16xf32>
    %c48 = arith.constant 48 : index
    %c0_38 = arith.constant 0 : index
    %113 = vector.load %arg6[%c48, %c0_38] : memref<64x64xbf16, #tpu.memory_space<vmem>>, vector<16x64xbf16>
    %114 = arith.truncf %112 : vector<16x16xf32> to vector<16x16xbf16>
    %cst_39 = arith.constant dense<0.000000e+00> : vector<16x64xf32>
    %115 = tpu.matmul %114, %113, %cst_39 {dimension_numbers = #tpu.dot_dimension_numbers<[1], [0], [0], [1], [0, 0, 1, 1], [], []>} : vector<16x16xbf16>, vector<16x64xbf16>, vector<16x64xf32> -> vector<16x64xf32>
    %116 = arith.addf %95, %115 : vector<16x64xf32>
    %117 = arith.mulf %116, %116 : vector<16x64xf32>
    %cst_40 = arith.constant dense<0.000000e+00> : vector<16xf32>
    %118 = vector.multi_reduction <add>, %117, %cst_40 [1] : vector<16x64xf32> to vector<16xf32>
    %119 = vector.shape_cast %118 : vector<16xf32> to vector<16x1xf32>
    %cst_41 = arith.constant 6.400000e+01 : f32
    %120 = vector.broadcast %cst_41 : f32 to vector<16x1xf32>
    %121 = arith.divf %119, %120 : vector<16x1xf32>
    %cst_42 = arith.constant 9.99999997E-7 : f32
    %122 = vector.broadcast %cst_42 : f32 to vector<16x1xf32>
    %123 = arith.addf %121, %122 : vector<16x1xf32>
    %124 = math.rsqrt %123 : vector<16x1xf32>
    %125 = vector.broadcast %124 : vector<16x1xf32> to vector<16x64xf32>
    %126 = arith.mulf %116, %125 : vector<16x64xf32>
    %c1_43 = arith.constant 1 : index
    %c0_44 = arith.constant 0 : index
    %127 = vector.load %arg4[%c1_43, %c0_44] : memref<2x64xf32, #tpu.memory_space<vmem>>, vector<1x64xf32>
    %128 = vector.broadcast %127 : vector<1x64xf32> to vector<16x64xf32>
    %129 = arith.mulf %126, %128 : vector<16x64xf32>
    %130 = arith.truncf %129 : vector<16x64xf32> to vector<16x64xbf16>
    %c0_45 = arith.constant 0 : index
    %c0_46 = arith.constant 0 : index
    %131 = vector.load %arg7[%c0_45, %c0_46] : memref<64x256xbf16, #tpu.memory_space<vmem>>, vector<64x256xbf16>
    %cst_47 = arith.constant dense<0.000000e+00> : vector<16x256xf32>
    %132 = tpu.matmul %130, %131, %cst_47 {dimension_numbers = #tpu.dot_dimension_numbers<[1], [0], [0], [1], [0, 0, 1, 1], [], []>} : vector<16x64xbf16>, vector<64x256xbf16>, vector<16x256xf32> -> vector<16x256xf32>
    %c0_48 = arith.constant 0 : index
    %c0_49 = arith.constant 0 : index
    %133 = vector.load %arg8[%c0_48, %c0_49] : memref<1x256xf32, #tpu.memory_space<vmem>>, vector<1x256xf32>
    %134 = vector.broadcast %133 : vector<1x256xf32> to vector<16x256xf32>
    %135 = arith.addf %132, %134 : vector<16x256xf32>
    %136 = vector.extract_strided_slice %135 {offsets = [0, 0], sizes = [16, 128], strides = [1, 1]} : vector<16x256xf32> to vector<16x128xf32>
    %cst_50 = arith.constant 5.000000e-01 : f32
    %137 = vector.broadcast %cst_50 : f32 to vector<16x128xf32>
    %138 = arith.mulf %137, %136 : vector<16x128xf32>
    %cst_51 = arith.constant 4.471500e-02 : f32
    %139 = vector.broadcast %cst_51 : f32 to vector<16x128xf32>
    %140 = arith.mulf %139, %136 : vector<16x128xf32>
    %141 = arith.mulf %140, %136 : vector<16x128xf32>
    %142 = arith.mulf %141, %136 : vector<16x128xf32>
    %143 = arith.addf %136, %142 : vector<16x128xf32>
    %cst_52 = arith.constant 0.797884583 : f32
    %144 = vector.broadcast %cst_52 : f32 to vector<16x128xf32>
    %145 = arith.mulf %144, %143 : vector<16x128xf32>
    %146 = math.tanh %145 : vector<16x128xf32>
    %cst_53 = arith.constant 1.000000e+00 : f32
    %147 = vector.broadcast %cst_53 : f32 to vector<16x128xf32>
    %148 = arith.addf %147, %146 : vector<16x128xf32>
    %149 = arith.mulf %138, %148 : vector<16x128xf32>
    %150 = vector.extract_strided_slice %135 {offsets = [0, 128], sizes = [16, 128], strides = [1, 1]} : vector<16x256xf32> to vector<16x128xf32>
    %151 = arith.mulf %149, %150 : vector<16x128xf32>
    %152 = arith.truncf %151 : vector<16x128xf32> to vector<16x128xbf16>
    %c0_54 = arith.constant 0 : index
    %c0_55 = arith.constant 0 : index
    %153 = vector.load %arg9[%c0_54, %c0_55] : memref<128x64xbf16, #tpu.memory_space<vmem>>, vector<128x64xbf16>
    %cst_56 = arith.constant dense<0.000000e+00> : vector<16x64xf32>
    %154 = tpu.matmul %152, %153, %cst_56 {dimension_numbers = #tpu.dot_dimension_numbers<[1], [0], [0], [1], [0, 0, 1, 1], [], []>} : vector<16x128xbf16>, vector<128x64xbf16>, vector<16x64xf32> -> vector<16x64xf32>
    %c0_57 = arith.constant 0 : index
    %c0_58 = arith.constant 0 : index
    %155 = vector.load %arg10[%c0_57, %c0_58] : memref<1x64xf32, #tpu.memory_space<vmem>>, vector<1x64xf32>
    %156 = vector.broadcast %155 : vector<1x64xf32> to vector<16x64xf32>
    %157 = arith.addf %154, %156 : vector<16x64xf32>
    %158 = arith.addf %157, %116 : vector<16x64xf32>
    %c0_59 = arith.constant 0 : index
    %c0_60 = arith.constant 0 : index
    %159 = vector.load %arg11[%c0_59, %c0_60] : memref<16x64xf32, #tpu.memory_space<vmem>>, vector<16x64xf32>
    tpu.vector_store %arg11[%c0_59, %c0_60], %158 {strides = array<i32>} : memref<16x64xf32, #tpu.memory_space<vmem>>, vector<16x64xf32>,
    return
  }
  func.func @transform_0(%arg0: i32) -> (i32, i32) {
    %c0_i32 = arith.constant 0 : i32
    %c0_i32_0 = arith.constant 0 : i32
    %c0_i32_1 = arith.constant 0 : i32
    return %c0_i32, %c0_i32_0 : i32, i32
  }
  func.func @transform_1(%arg0: i32) -> (i32, i32, i32) {
    %c0_i32 = arith.constant 0 : i32
    %c0_i32_0 = arith.constant 0 : i32
    %c0_i32_1 = arith.constant 0 : i32
    %c0_i32_2 = arith.constant 0 : i32
    return %c0_i32, %c0_i32_0, %c0_i32_1 : i32, i32, i32
  }
  func.func @transform_2(%arg0: i32) -> (i32, i32) {
    %c0_i32 = arith.constant 0 : i32
    %c0_i32_0 = arith.constant 0 : i32
    %c0_i32_1 = arith.constant 0 : i32
    return %c0_i32, %c0_i32_0 : i32, i32
  }
  func.func @transform_3(%arg0: i32) -> (i32, i32) {
    %c0_i32 = arith.constant 0 : i32
    %c0_i32_0 = arith.constant 0 : i32
    %c0_i32_1 = arith.constant 0 : i32
    return %c0_i32, %c0_i32_0 : i32, i32
  }
  func.func @transform_4(%arg0: i32) -> (i32, i32) {
    %c0_i32 = arith.constant 0 : i32
    %c0_i32_0 = arith.constant 0 : i32
    %c0_i32_1 = arith.constant 0 : i32
    return %c0_i32, %c0_i32_0 : i32, i32
  }
  func.func @transform_5(%arg0: i32) -> (i32, i32) {
    %c0_i32 = arith.constant 0 : i32
    %c0_i32_0 = arith.constant 0 : i32
    %c0_i32_1 = arith.constant 0 : i32
    return %c0_i32, %c0_i32_0 : i32, i32
  }
  func.func @transform_6(%arg0: i32) -> (i32, i32) {
    %c0_i32 = arith.constant 0 : i32
    %c0_i32_0 = arith.constant 0 : i32
    %c0_i32_1 = arith.constant 0 : i32
    return %c0_i32, %c0_i32_0 : i32, i32
  }
  func.func @transform_7(%arg0: i32) -> (i32, i32) {
    %c0_i32 = arith.constant 0 : i32
    %c0_i32_0 = arith.constant 0 : i32
    %c0_i32_1 = arith.constant 0 : i32
    return %c0_i32, %c0_i32_0 : i32, i32
  }
  func.func @transform_8(%arg0: i32) -> (i32, i32) {
    %c0_i32 = arith.constant 0 : i32
    %c0_i32_0 = arith.constant 0 : i32
    %c0_i32_1 = arith.constant 0 : i32
    return %c0_i32, %c0_i32_0 : i32, i32
  }
  func.func @transform_9(%arg0: i32) -> (i32, i32) {
    %c0_i32 = arith.constant 0 : i32
    %c0_i32_0 = arith.constant 0 : i32
    %c0_i32_1 = arith.constant 0 : i32
    return %c0_i32, %c0_i32_0 : i32, i32
  }
  func.func @transform_10(%arg0: i32) -> (i32, i32) {
    %c0_i32 = arith.constant 0 : i32
    %c0_i32_0 = arith.constant 0 : i32
    %c0_i32_1 = arith.constant 0 : i32
    return %c0_i32, %c0_i32_0 : i32, i32
  }
}

</mosaic_0001>

<bundles_post_ra>
// kernel: tpu_custom_call.1
= control target key start
LH: loop header
LB: loop body
LE: loop exit
PB: predicated region body
PF: predicated region fallthrough
CT: control target
= control target key end

     0   :  { %15 = vsyncpa [#allocation3], 0  ;;  %s1981_s0 = inlined_call_operand.hbm [shape: f32[16,64], index: 0, kind: input, shape index: {}]   ;;  %s1982_s1 = inlined_call_operand.vmem [shape: f32[2,16,96], index: 1, kind: input, shape index: {}]   ;;  %s1983_s2 = inlined_call_operand.hbm [shape: f32[16,16], index: 2, kind: input, shape index: {}]   ;;  %s1984_s3 = inlined_call_operand.vmem [shape: f32[2,64], index: 3, kind: input, shape index: {}]   ;;  %s1985_s4 = inlined_call_operand.vmem [shape: bf16[64,224], index: 4, kind: input, shape index: {}]   ;;  %s1986_s5 = inlined_call_operand.hbm [shape: bf16[64,64], index: 5, kind: input, shape index: {}]   ;;  %s1987_s6 = inlined_call_operand.hbm [shape: bf16[64,256], index: 6, kind: input, shape index: {}]   ;;  %s1988_s7 = inlined_call_operand.vmem [shape: f32[1,256], index: 7, kind: input, shape index: {}]   ;;  %s1989_s8 = inlined_call_operand.vmem [shape: bf16[128,64], index: 8, kind: input, shape index: {}]   ;;  %s1990_s9 = inlined_call_operand.vmem [shape: f32[1,64], index: 9, kind: input, shape index: {}]   ;;  %s1991_s10 = inlined_call_operand.hbm [shape: f32[16,64], index: 10, kind: output, shape index: {}]  }
   0x1   :  { %16 = vsyncpa [#allocation6], 0 }
   0x2   :  { %17 = vsyncpa [#allocation9], 0 }
   0x3   :  { %18 = vsyncpa [#allocation4], 0  ;;  %s1606_s13 = smov [#allocation5]   ;;  %s1607_s15 = smov [#allocation2]  }
   0x4   :  { %s38_s14 = sshll.u32 %s1606_s13, 4  ;;  %s24_s16 = sshll.u32 %s1607_s15, 4  ;;  %s39_s14 = int_to_ptr.vmem [resolvable:$true] %s38_s14  ;;  %s1679_s16 = int_to_ptr.vmem [resolvable:$true] %s24_s16 }
   0x5   :  { %s1488_s19 = scalar_lea.hbm %s1983_s2, 256 }
   0x6   :  { %p1489_p0 = scmp.ne.s32.totalorder %s1983_s2, %s1488_s19  ;;  %p1492_p1 = scmp.lt.u32.totalorder %s1488_s19, %s1983_s2 }
   0x8   :  { %p1494_p2 = pnand %p1492_p1, %p1489_p0 }
   0xa   :  { %1497 = shalt.err (!%p1494_p2)
}
   0xb   :  { %s1498_s24 = scalar_lea.vmem %s39_s14, 256  ;;  %p1503_p4 = scmp.lt.s32.totalorder %s39_s14, %s39_s14 }
   0xc   :  { %p1499_p3 = scmp.ne.s32.totalorder %s39_s14, %s1498_s24  ;;  %p1504_p5 = scmp.lt.s32.totalorder %s1498_s24, %s1498_s24 }
   0xe   :  { %p1505_p6 = por %p1504_p5, %p1503_p4 }
  0x10   :  { %p1506_p7 = pnand %p1505_p6, %p1499_p3 }
  0x12   :  { %1509 = shalt.err (!%p1506_p7)
}
  0x13   :  { %s1608_s25 = smov 128   ;;  %s1609_s26 = smov 8  }
  0x14   :  { %44 = dma.hbm_to_vmem [thread:$0]  %s1983_s2, 256, %s39_s14, [#allocation6], %s1608_s25, %s1608_s25, %s1609_s26  }
  0x15   :  { %s1510_s11 = scalar_lea.hbm %s1981_s0, 256 }
  0x16   :  { %p1511_p8 = scmp.ne.s32.totalorder %s1981_s0, %s1510_s11  ;;  %p1514_p9 = scmp.lt.u32.totalorder %s1510_s11, %s1981_s0 }
  0x18   :  { %p1516_p10 = pnand %p1514_p9, %p1511_p8 }
  0x1a   :  { %1519 = shalt.err (!%p1516_p10)
}
  0x1b   :  { %s1520_s18 = scalar_lea.vmem %s1679_s16, 256  ;;  %p1525_p12 = scmp.lt.s32.totalorder %s1679_s16, %s1679_s16 }
  0x1c   :  { %p1521_p11 = scmp.ne.s32.totalorder %s1679_s16, %s1520_s18  ;;  %p1526_p13 = scmp.lt.s32.totalorder %s1520_s18, %s1520_s18 }
  0x1e   :  { %p1527_p0 = por %p1526_p13, %p1525_p12 }
  0x20   :  { %p1528_p1 = pnand %p1527_p0, %p1521_p11 }
  0x22   :  { %1531 = shalt.err (!%p1528_p1)
}
  0x23   :  { %30 = dma.hbm_to_vmem [thread:$0]  %s1981_s0, 256, %s1679_s16, [#allocation3], %s1608_s25, %s1608_s25, %s1609_s26  }
  0x24   :  { %s1610_s19 = smov [#allocation7]   ;;  %s1532_s23 = scalar_lea.hbm %s1986_s5, 512 }
  0x25   :  { %s54_s20 = sshll.u32 %s1610_s19, 4  ;;  %p1533_p2 = scmp.ne.s32.totalorder %s1986_s5, %s1532_s23  ;;  %s55_s20 = int_to_ptr.vmem [resolvable:$true] %s54_s20 }
  0x26   :  { %p1536_p3 = scmp.lt.u32.totalorder %s1532_s23, %s1986_s5 }
  0x28   :  { %p1538_p4 = pnand %p1536_p3, %p1533_p2 }
  0x2a   :  { %1541 = shalt.err (!%p1538_p4)
}
  0x2b   :  { %s1542_s30 = scalar_lea.vmem %s55_s20, 512  ;;  %p1547_p6 = scmp.lt.s32.totalorder %s55_s20, %s55_s20 }
  0x2c   :  { %p1543_p5 = scmp.ne.s32.totalorder %s55_s20, %s1542_s30  ;;  %p1548_p7 = scmp.lt.s32.totalorder %s1542_s30, %s1542_s30 }
  0x2e   :  { %p1549_p8 = por %p1548_p7, %p1547_p6 }
  0x30   :  { %p1550_p9 = pnand %p1549_p8, %p1543_p5 }
  0x32   :  { %1553 = shalt.err (!%p1550_p9)
}
  0x33   :  { %s1611_s0 = smov 64   ;;  %s1612_s16 = smov 4  }
  0x34   :  { %60 = dma.hbm_to_vmem [thread:$0]  %s1986_s5, 512, %s55_s20, [#allocation6], %s1611_s0, %s1611_s0, %s1612_s16  }
  0x35   :  { %s1613_s13 = smov [#allocation8]   ;;  %s1554_s2 = scalar_lea.hbm %s1987_s6, 1024 }
  0x36   :  { %s66_s15 = sshll.u32 %s1613_s13, 4  ;;  %p1555_p10 = scmp.ne.s32.totalorder %s1987_s6, %s1554_s2  ;;  %s67_s15 = int_to_ptr.vmem [resolvable:$true] %s66_s15 }
  0x37   :  { %p1558_p11 = scmp.lt.u32.totalorder %s1554_s2, %s1987_s6 }
  0x39   :  { %p1560_p12 = pnand %p1558_p11, %p1555_p10 }
  0x3b   :  { %1563 = shalt.err (!%p1560_p12)
}
  0x3c   :  { %s1564_s23 = scalar_lea.vmem %s67_s15, 1024  ;;  %p1569_p0 = scmp.lt.s32.totalorder %s67_s15, %s67_s15 }
  0x3d   :  { %p1565_p13 = scmp.ne.s32.totalorder %s67_s15, %s1564_s23  ;;  %p1570_p1 = scmp.lt.s32.totalorder %s1564_s23, %s1564_s23 }
  0x3f   :  { %p1571_p2 = por %p1570_p1, %p1569_p0 }
  0x41   :  { %p1572_p3 = pnand %p1571_p2, %p1565_p13 }
  0x43   :  { %1575 = shalt.err (!%p1572_p3)
}
  0x44   :  { %72 = dma.hbm_to_vmem [thread:$0]  %s1987_s6, 1024, %s67_s15, [#allocation9], %s1608_s25, %s1608_s25, %s1609_s26  }
  0x45   :  { %1598 = dma.done.wait [#allocation3], 256  }
  0x46   :  { %1599 = vsyncadd [#allocation3], 4294967040 }
  0x47   :  { %1600 = dma.done.wait [#allocation6], 768  }
  0x48   :  { %1601 = vsyncadd [#allocation6], 4294966528 }
  0x49   :  { %1602 = dma.done.wait [#allocation9], 1024  }
  0x4a   :  { %1603 = vsyncadd [#allocation9], 4294966272  ;;  %v1745_v0 = vld [vmem:[#allocation2] sm:$0xff]  ;;  %vm96_vm0 = vcmask 523264   ;;  %v1747_v1 = vld [vmem:[#allocation2 + $0x8] sm:$0xff]  ;;  %v1614_v11 = vmov 0  }
  0x4b   :  { %v94_v2 = vmul.f32 %v1745_v0, %v1745_v0  ;;  %v95_v3 = vmul.f32 %v1747_v1, %v1747_v1  ;;  %v1408_v6 = vld [vmem:[%s1985_s4 + $0x4] ss:$8 sps:$4 sm:$0xff]   ;;  %v1410_v7 = vld [vmem:[%s1985_s4] ss:$8 sps:$4 sm:$0xff]   ;;  %v1411_v8 = vld [vmem:[%s1985_s4 + $0x14] ss:$8 sps:$4 sm:$0xff]   ;;  %203 = vmatprep.mubr.bf16.mxu1 %v1614_v11 }
  0x4c   :  { %171 = vmatprep.subr.bf16.mxu1 %v1408_v6  ;;  %v1413_v9 = vld [vmem:[%s1985_s4 + $0x10] ss:$8 sps:$4 sm:$0xff]   ;;  %v1414_v10 = vld [vmem:[%s1985_s4 + $0x24] ss:$8 sps:$4 sm:$0xff]   ;;  %v1416_v12 = vld [vmem:[%s1985_s4 + $0x20] ss:$8 sps:$4 sm:$0xff]  }
  0x4d   :  { %v97_v4 = vsel %vm96_vm0, %v94_v2, 0.0  ;;  %v100_v5 = vsel %vm96_vm0, %v95_v3, 0.0  ;;  %172 = vmatpush1.bf16.msra.mxu1 %v1410_v7  ;;  %v1417_v13 = vld [vmem:[%s1985_s4 + $0x34] ss:$8 sps:$4 sm:$0xff]   ;;  %v1419_v14 = vld [vmem:[%s1985_s4 + $0x30] ss:$8 sps:$4 sm:$0xff]  }
  0x4e   :  { %98 = vadd.xlane.f32.xlu0 %v97_v4  ;;  %173 = vmatprep.subr.bf16.mxu1 %v1411_v8  ;;  %v1204_v24 = vld [vmem:[%s1984_s3] ss:$0 sm:$0xff]  ;;  %v1615_v29 = vmov 0.0   ;;  %v1214_v31 = vld [vmem:[%s1982_s1 + $0x10] sm:$0xff]  ;;  %vm1616_vm1 = vmmov 0   ;;  %v215_v33 = vld [vmem:[%s1982_s1 + $0x8] sm:$0xff] }
  0x4f   :  { %1296 = vmatprep.subr.bf16.mxu0 %v1615_v29  ;;  %v214_v30 = vld [vmem:[%s1982_s1] sm:$0xff]  ;;  %1298 = vmatprep.mubr.msk.bf16.mxu0 %vm1616_vm1, %v1615_v29  ;;  %v1215_v36 = vld [vmem:[%s1982_s1 + $0x18] sm:$0xff]  ;;  %vm232_vm2 = vcmask 130048   ;;  %v1816_v48 = vld [vmem:[#allocation5] sm:$0xff]  ;;  %s1617_s1 = smov 96   ;;  %s1619_s29 = smov 112  }
  0x50   :  { %v1818_v50 = vld [vmem:[#allocation5 + $0x8] sm:$0xff]  ;;  %s1620_s30 = smov 48   ;;  %s1621_s16 = smov 80  }
  0x51   :  { %174 = vmatpush1.bf16.msra.mxu1 %v1413_v9  ;;  %s1622_s11 = smov 16  }
  0x52   :  { %101 = vadd.xlane.f32.xlu0 %v100_v5  ;;  %175 = vmatprep.subr.bf16.mxu1 %v1414_v10 }
  0x55   :  { %176 = vmatpush1.bf16.msra.mxu1 %v1416_v12 }
  0x56   :  { %177 = vmatprep.subr.bf16.mxu1 %v1417_v13 }
  0x59   :  { %178 = vmatpush1.bf16.msra.mxu1 %v1419_v14 }
  0x5a   :  { %1284 = vmatprep.subr.bf16.mxu1 %v1615_v29 }
  0xdb   :  { %v99_v15 = vpop.xlane.xlu0 %98 }
  0xdc   :  { %v104_v16 = vmul.f32 0.015625, %v99_v15 }
  0xde   :  { %v106_v17 = vadd.f32 1e-06, %v104_v16 }
  0xdf   :  { %v102_v18 = vpop.xlane.xlu0 %101 }
  0xe0   :  { %1444 = vrsqrt.f32 %v106_v17  ;;  %v105_v19 = vmul.f32 0.015625, %v102_v18 }
  0xe2   :  { %v107_v20 = vadd.f32 1e-06, %v105_v19 }
  0xe4   :  { %1446 = vrsqrt.f32 %v107_v20 }
  0xea   :  { %v1445_v21 = vpop.eup %1444 }
  0xeb   :  { %v110_v22 = vmul.f32 %v1445_v21, %v1745_v0 }
  0xed   :  { %v117_v26 = vmul.f32 %v1204_v24, %v110_v22 }
  0xee   :  { %v1447_v23 = vpop.eup %1446 }
  0xef   :  { %v111_v25 = vmul.f32 %v1447_v23, %v1747_v1 }
  0xf1   :  { %v118_v27 = vmul.f32 %v1204_v24, %v111_v25 }
  0xf3   :  { %v119_v28 = vpack.c.bf16 %v118_v27, %v117_v26 }
  0xf5   :  { %1213 = vmatmul.mubr.msk.bf16.vlgmr.msra.gmra.mrb[0].mxu1 %vm96_vm0, %v119_v28 }
  0xf6   :  { %1286 = vmatprep.mubr.msk.bf16.mxu1 %vm1616_vm1, %v1615_v29 }
 0x1c8   :  { %v205_v32 = vpop.f32.mrb[0].mxu1 }
 0x1c9   :  { %v219_v34 = vmul.f32 %v214_v30, %v205_v32  ;;  %v207_v35 = vpop.f32.mrb[1].mxu1 }
 0x1ca   :  { %v221_v37 = vmul.f32 %v1214_v31, %v207_v35  ;;  %v209_v38 = vpop.f32.mrb[2].mxu1 }
 0x1cb   :  { %v220_v39 = vmul.f32 %v215_v33, %v209_v38  ;;  %v1804_v40 = vpack.c.bf16 %v209_v38, %v205_v32  ;;  %v211_v41 = vpop.f32.mrb[3].mxu1 }
 0x1cc   :  { %v223_v42 = vadd.f32 %v221_v37, %v219_v34  ;;  %v222_v43 = vmul.f32 %v1215_v36, %v211_v41  ;;  %v1420_v34 = vld [vmem:[#allocation7] sm:$0xff]  }
 0x1cd   :  { %1297 = vmatpush3.bf16.msra.mxu0 %v1420_v34 }
 0x1ce   :  { %v224_v44 = vadd.f32 %v222_v43, %v220_v39  ;;  %1308 = vmatprep.subr.bf16.mxu0 %v1615_v29 }
 0x1d0   :  { %v1806_v45 = vpack.c.bf16 %v224_v44, %v223_v42 }
 0x1d2   :  { %230 = vrot.lane.b32.xlu1 %v1806_v45, %s1611_s0  ;;  %s1618_s0 = smov 32  }
 0x244   :  { %v231_v46 = vpop.permute.xlu1 %230 }
 0x245   :  { %v237_v47 = vsel %vm232_vm2, %v231_v46, 0 }
 0x246   :  { %1285 = vmatpush3.bf16.xpose.msra.mxu1 %v237_v47 }
 0x247   :  { %1290 = vmatprep.subr.bf16.mxu1 %v1615_v29 }
 0x24d   :  { %1287 = vmatmul.mubr.msk.bf16.vlgmr.msra.gmra.mrb[4].mxu1 %vm232_vm2, %v1806_v45 }
 0x24e   :  { %1292 = vmatprep.mubr.msk.bf16.mxu1 %vm1616_vm1, %v1615_v29 }
 0x320   :  { %v273_v49 = vpop.f32.mrb[4].mxu1 }
 0x321   :  { %v274_v51 = vadd.f32 %v273_v49, %v1816_v48  ;;  %v1288_v52 = vpop.f32.mrb[5].mxu1 }
 0x322   :  { %v276_v53 = vpop.f32.mrb[6].mxu1 }
 0x323   :  { %v277_v54 = vadd.f32 %v276_v53, %v1818_v50  ;;  %v1289_v55 = vpop.f32.mrb[7].mxu1  ;;  %v280_v56 = vsel %vm232_vm2, %v274_v51, -inf }
 0x324   :  { %281 = vmax.xlane.f32.xlu1 %v280_v56 }
 0x325   :  { %v283_v57 = vsel %vm232_vm2, %v277_v54, -inf }
 0x326   :  { %284 = vmax.xlane.f32.xlu0 %v283_v57 }
 0x335   :  { %574 = vrot.lane.b32.xlu1 %v1806_v45, %s1617_s1 }
 0x33c   :  { %300 = vrot.lane.b32.xlu0 %v1804_v40, %s1618_s0  ;;  %s1623_s0 = smov [#allocation10]  }
 0x340   :  { %406 = vrot.lane.b32.xlu0 %v1806_v45, %s1619_s29  ;;  %s1190_s29 = sshll.u32 %s1623_s0, 4  ;;  %s1191_s29 = int_to_ptr.vmem [resolvable:$true] %s1190_s29 }
 0x341   :  { %p1581_p5 = scmp.lt.s32.totalorder %s1191_s29, %s1191_s29 }
 0x344   :  { %576 = vrot.lane.b32.xlu0 %v1806_v45, %s1620_s30  ;;  %s1576_s30 = scalar_lea.vmem %s1191_s29, 256 }
 0x345   :  { %p1577_p4 = scmp.ne.s32.totalorder %s1191_s29, %s1576_s30  ;;  %p1582_p6 = scmp.lt.s32.totalorder %s1576_s30, %s1576_s30 }
 0x347   :  { %p1583_p7 = por %p1582_p6, %p1581_p5 }
 0x349   :  { %p1584_p8 = pnand %p1583_p7, %p1577_p4 }
 0x3b1   :  { %v282_v58 = vpop.xlane.xlu1 %281 }
 0x3b2   :  { %v286_v59 = vsub.f32 %v274_v51, %v282_v58 }
 0x3b3   :  { %v285_v60 = vpop.xlane.xlu0 %284 }
 0x3b4   :  { %v288_v61 = vmul.f32 1.442695, %v286_v59  ;;  %v287_v62 = vsub.f32 %v277_v54, %v285_v60 }
 0x3b5   :  { %v575_v9 = vpop.permute.xlu1 %574 }
 0x3b6   :  { %v290_v63 = vmul.f32 1.442695, %v287_v62  ;;  %1448 = vpow2.f32 %v288_v61 }
 0x3b7   :  { %v1828_v2 = vpop.permute.xlu0 %300 }
 0x3b8   :  { %1450 = vpow2.f32 %v290_v63  ;;  %1291 = vmatpush3.bf16.msra.mxu1 %v1828_v2 }
 0x3b9   :  { %1302 = vmatprep.subr.bf16.mxu1 %v1615_v29 }
 0x3bb   :  { %v407_v6 = vpop.permute.xlu0 %406 }
 0x3bf   :  { %v577_v7 = vpop.permute.xlu0 %576 }
 0x3c0   :  { %v1449_v3 = vpop.eup %1448  ;;  %v582_v8 = vsel %vm232_vm2, %v577_v7, 0 }
 0x3c1   :  { %v292_v28 = vsel %vm232_vm2, %v1449_v3, 0.0 }
 0x3c2   :  { %v1451_v4 = vpop.eup %1450 }
 0x3c3   :  { %v298_v5 = vpack.c.bf16 %v1451_v4, %v1449_v3  ;;  %v295_v30 = vsel %vm232_vm2, %v1451_v4, 0.0 }
 0x3c5   :  { %1293 = vmatmul.mubr.msk.bf16.vlgmr.msra.gmra.mrb[8].mxu1 %vm232_vm2, %v298_v5  ;;  %v1421_v5 = vld [vmem:[#allocation7 + $0x8] sm:$0xff]  }
 0x3c6   :  { %1303 = vmatpush3.bf16.xpose.msra.mxu1 %v237_v47  ;;  %1304 = vmatprep.mubr.msk.bf16.mxu1 %vm1616_vm1, %v1615_v29 }
 0x3c7   :  { %1320 = vmatprep.subr.bf16.mxu1 %v1615_v29 }
 0x3cd   :  { %1305 = vmatmul.mubr.msk.bf16.vlgmr.msra.gmra.mrb[12].mxu1 %vm232_vm2, %v407_v6 }
 0x3ce   :  { %1321 = vmatpush3.bf16.xpose.msra.mxu1 %v582_v8  ;;  %1322 = vmatprep.mubr.msk.bf16.mxu1 %vm1616_vm1, %v1615_v29 }
 0x3cf   :  { %1326 = vmatprep.subr.bf16.mxu1 %v1615_v29 }
 0x3d5   :  { %1323 = vmatmul.mubr.msk.bf16.vlgmr.msra.gmra.mrb[16].mxu1 %vm232_vm2, %v575_v9 }
 0x3d6   :  { %1328 = vmatprep.mubr.msk.bf16.mxu1 %vm1616_vm1, %v1615_v29 }
 0x498   :  { %v1844_v10 = vpop.f32.mrb[8].mxu1 }
 0x499   :  { %v1294_v12 = vpop.f32.mrb[9].mxu1 }
 0x49a   :  { %v1846_v13 = vpop.f32.mrb[10].mxu1 }
 0x49b   :  { %v1295_v14 = vpop.f32.mrb[11].mxu1 }
 0x4a0   :  { %v445_v15 = vpop.f32.mrb[12].mxu1 }
 0x4a1   :  { %v1306_v16 = vpop.f32.mrb[13].mxu1  ;;  %v446_v27 = vadd.f32 %v445_v15, %v1816_v48 }
 0x4a2   :  { %v448_v17 = vpop.f32.mrb[14].mxu1 }
 0x4a3   :  { %v1307_v18 = vpop.f32.mrb[15].mxu1  ;;  %v449_v31 = vadd.f32 %v448_v17, %v1818_v50  ;;  %v452_v32 = vsel %vm232_vm2, %v446_v27, -inf }
 0x4a5   :  { %v455_v33 = vsel %vm232_vm2, %v449_v31, -inf }
 0x4a8   :  { %v618_v19 = vpop.f32.mrb[16].mxu1 }
 0x4a9   :  { %v619_v20 = vadd.f32 %v618_v19, %v1816_v48  ;;  %v1324_v21 = vpop.f32.mrb[17].mxu1 }
 0x4aa   :  { %v621_v22 = vpop.f32.mrb[18].mxu1 }
 0x4ab   :  { %v622_v23 = vadd.f32 %v621_v22, %v1818_v50  ;;  %v1325_v24 = vpop.f32.mrb[19].mxu1  ;;  %v625_v25 = vsel %vm232_vm2, %v619_v20, -inf }
 0x4ac   :  { %626 = vmax.xlane.f32.xlu0 %v625_v25 }
 0x4ad   :  { %v628_v26 = vsel %vm232_vm2, %v622_v23, -inf }
 0x4ae   :  { %629 = vmax.xlane.f32.xlu1 %v628_v26 }
 0x4bf   :  { %750 = vrot.lane.b32.xlu1 %v1806_v45, %s1621_s16 }
 0x4c2   :  { %644 = vrot.lane.b32.xlu0 %v1804_v40, %s1622_s11 }
 0x4e1   :  { %293 = vadd.xlane.f32.xlu0 %v292_v28 }
 0x4e3   :  { %296 = vadd.xlane.f32.xlu1 %v295_v30 }
 0x4e5   :  { %453 = vmax.xlane.f32.xlu0 %v452_v32 }
 0x4e9   :  { %456 = vmax.xlane.f32.xlu0 %v455_v33 }
 0x539   :  { %v627_v35 = vpop.xlane.xlu0 %626 }
 0x53a   :  { %v631_v36 = vsub.f32 %v619_v20, %v627_v35 }
 0x53b   :  { %v630_v37 = vpop.xlane.xlu1 %629 }
 0x53c   :  { %v633_v38 = vmul.f32 1.442695, %v631_v36  ;;  %v632_v39 = vsub.f32 %v622_v23, %v630_v37  ;;  %v1422_v36 = vld [vmem:[#allocation7 + $0x10] sm:$0xff]  }
 0x53d   :  { %v1861_v40 = vpop.permute.xlu0 %644 }
 0x53e   :  { %v635_v41 = vmul.f32 1.442695, %v632_v39  ;;  %1327 = vmatpush3.bf16.msra.mxu1 %v1861_v40  ;;  %1452 = vpow2.f32 %v633_v38 }
 0x53f   :  { %1338 = vmatprep.subr.bf16.mxu1 %v1615_v29  ;;  %v751_v45 = vpop.permute.xlu1 %750 }
 0x540   :  { %1454 = vpow2.f32 %v635_v41 }
 0x548   :  { %v1453_v42 = vpop.eup %1452 }
 0x54a   :  { %v1455_v43 = vpop.eup %1454 }
 0x54b   :  { %v643_v44 = vpack.c.bf16 %v1455_v43, %v1453_v42  ;;  %v640_v4 = vsel %vm232_vm2, %v1455_v43, 0.0 }
 0x54d   :  { %1329 = vmatmul.mubr.msk.bf16.vlgmr.msra.gmra.mrb[20].mxu1 %vm232_vm2, %v643_v44 }
 0x54e   :  { %1339 = vmatpush3.bf16.xpose.msra.mxu1 %v582_v8  ;;  %1340 = vmatprep.mubr.msk.bf16.mxu1 %vm1616_vm1, %v1615_v29 }
 0x555   :  { %1341 = vmatmul.mubr.msk.bf16.vlgmr.msra.gmra.mrb[24].mxu1 %vm232_vm2, %v751_v45 }
 0x556   :  { %1037 = vmatprep.mubr.bf16.mxu1 %v1614_v11 }
 0x56e   :  { %v294_v46 = vpop.xlane.xlu0 %293 }
 0x56f   :  { %1456 = vrcp.f32 %v294_v46 }
 0x570   :  { %v297_v47 = vpop.xlane.xlu1 %296 }
 0x571   :  { %1458 = vrcp.f32 %v297_v47 }
 0x572   :  { %v454_v49 = vpop.xlane.xlu0 %453 }
 0x573   :  { %v458_v51 = vsub.f32 %v446_v27, %v454_v49  ;;  %v1423_v49 = vld [vmem:[#allocation7 + $0x18] sm:$0xff]  }
 0x575   :  { %v460_v52 = vmul.f32 1.442695, %v458_v51 }
 0x576   :  { %v457_v53 = vpop.xlane.xlu0 %456 }
 0x577   :  { %1460 = vpow2.f32 %v460_v52  ;;  %v459_v54 = vsub.f32 %v449_v31, %v457_v53 }
 0x579   :  { %v1457_v55 = vpop.eup %1456  ;;  %v462_v56 = vmul.f32 1.442695, %v459_v54 }
 0x57a   :  { %v349_v58 = vmul.f32 %v1457_v55, %v1844_v10 }
 0x57b   :  { %v1459_v57 = vpop.eup %1458  ;;  %1462 = vpow2.f32 %v462_v56 }
 0x57c   :  { %v350_v59 = vmul.f32 %v1459_v57, %v1846_v13 }
 0x57e   :  { %v353_v60 = vpack.c.bf16 %v350_v59, %v349_v58 }
 0x580   :  { %1299 = vmatmul.mubr.msk.bf16.vlgmr.msra.gmra.mrb[0].mxu0 %vm232_vm2, %v353_v60 }
 0x581   :  { %v1461_v11 = vpop.eup %1460  ;;  %1309 = vmatpush3.bf16.msra.mxu0 %v1828_v2  ;;  %1310 = vmatprep.mubr.msk.bf16.mxu0 %vm1616_vm1, %v1615_v29  ;;  %v637_v2 = vsel %vm232_vm2, %v1453_v42, 0.0 }
 0x582   :  { %v464_v61 = vsel %vm232_vm2, %v1461_v11, 0.0  ;;  %1314 = vmatprep.subr.bf16.mxu0 %v1615_v29 }
 0x583   :  { %465 = vadd.xlane.f32.xlu0 %v464_v61 }
 0x585   :  { %v1463_v62 = vpop.eup %1462 }
 0x586   :  { %v467_v63 = vsel %vm232_vm2, %v1463_v62, 0.0  ;;  %v470_v3 = vpack.c.bf16 %v1463_v62, %v1461_v11 }
 0x587   :  { %468 = vadd.xlane.f32.xlu0 %v467_v63 }
 0x588   :  { %1311 = vmatmul.mubr.msk.bf16.vlgmr.msra.gmra.mrb[4].mxu0 %vm232_vm2, %v470_v3 }
 0x589   :  { %1316 = vmatprep.mubr.msk.bf16.mxu0 %vm1616_vm1, %v1615_v29  ;;  %1315 = vmatpush3.bf16.msra.mxu0 %v1421_v5 }
 0x58a   :  { %1332 = vmatprep.subr.bf16.mxu0 %v1615_v29 }
 0x58b   :  { %638 = vadd.xlane.f32.xlu0 %v637_v2 }
 0x58f   :  { %641 = vadd.xlane.f32.xlu0 %v640_v4 }
 0x610   :  { %v466_v6 = vpop.xlane.xlu0 %465 }
 0x614   :  { %v469_v7 = vpop.xlane.xlu0 %468 }
 0x618   :  { %v639_v8 = vpop.xlane.xlu0 %638 }
 0x619   :  { %1464 = vrcp.f32 %v639_v8 }
 0x61c   :  { %v642_v9 = vpop.xlane.xlu0 %641 }
 0x61d   :  { %1466 = vrcp.f32 %v642_v9  ;;  %v1424_v9 = vld [vmem:[#allocation8] ss:$8 sps:$4 sm:$0xff]  }
 0x61e   :  { %1468 = vrcp.f32 %v466_v6 }
 0x61f   :  { %1470 = vrcp.f32 %v469_v7 }
 0x620   :  { %v684_v10 = vpop.f32.mrb[20].mxu1 }
 0x621   :  { %v1330_v12 = vpop.f32.mrb[21].mxu1 }
 0x622   :  { %v687_v13 = vpop.f32.mrb[22].mxu1  ;;  %v1432_v12 = vld [vmem:[#allocation8 + $0x24] ss:$8 sps:$4 sm:$0xff]  }
 0x623   :  { %v1331_v14 = vpop.f32.mrb[23].mxu1  ;;  %v1465_v15 = vpop.eup %1464 }
 0x624   :  { %v693_v17 = vmul.f32 %v1465_v15, %v684_v10  ;;  %v1429_v10 = vld [vmem:[#allocation8 + $0x14] ss:$8 sps:$4 sm:$0xff]   ;;  %v1433_v15 = vld [vmem:[#allocation8 + $0x30] ss:$8 sps:$4 sm:$0xff]  }
 0x625   :  { %v1435_v14 = vld [vmem:[#allocation8 + $0x34] ss:$8 sps:$4 sm:$0xff]  }
 0x627   :  { %v1467_v16 = vpop.eup %1466 }
 0x628   :  { %v694_v18 = vmul.f32 %v1467_v16, %v687_v13  ;;  %v789_v19 = vpop.f32.mrb[24].mxu1  ;;  %v1469_v30 = vpop.eup %1468  ;;  %v1430_v13 = vld [vmem:[#allocation8 + $0x20] ss:$8 sps:$4 sm:$0xff]  }
 0x629   :  { %v790_v20 = vadd.f32 %v789_v19, %v1816_v48  ;;  %v1342_v21 = vpop.f32.mrb[25].mxu1  ;;  %v1471_v32 = vpop.eup %1470 }
 0x62a   :  { %v697_v22 = vpack.c.bf16 %v694_v18, %v693_v17  ;;  %v792_v23 = vpop.f32.mrb[26].mxu1 }
 0x62b   :  { %v793_v24 = vadd.f32 %v792_v23, %v1818_v50  ;;  %v1343_v25 = vpop.f32.mrb[27].mxu1  ;;  %v796_v26 = vsel %vm232_vm2, %v790_v20, -inf }
 0x62c   :  { %797 = vmax.xlane.f32.xlu1 %v796_v26  ;;  %v1232_v25 = vld [vmem:[%s1984_s3 + $0x1] ss:$0 sm:$0xff] }
 0x62d   :  { %v799_v27 = vsel %vm232_vm2, %v793_v24, -inf }
 0x62e   :  { %800 = vmax.xlane.f32.xlu0 %v799_v27 }
 0x65b   :  { %v508_v28 = vpop.f32.mrb[4].mxu0 }
 0x65c   :  { %v1312_v31 = vpop.f32.mrb[5].mxu0  ;;  %v517_v48 = vmul.f32 %v1469_v30, %v508_v28 }
 0x65d   :  { %v511_v33 = vpop.f32.mrb[6].mxu0  ;;  %v1436_v31 = vld [vmem:[%s1989_s8] sm:$0xff]  }
 0x65e   :  { %v518_v34 = vmul.f32 %v1471_v32, %v511_v33  ;;  %v1313_v35 = vpop.f32.mrb[7].mxu0  ;;  %v1437_v32 = vld [vmem:[%s1989_s8 + $0x8] sm:$0xff]   ;;  %v1438_v33 = vld [vmem:[%s1989_s8 + $0x10] sm:$0xff]  }
 0x65f   :  { %v1441_v35 = vld [vmem:[%s1989_s8 + $0x28] sm:$0xff]  }
 0x660   :  { %v521_v37 = vpack.c.bf16 %v518_v34, %v517_v48  ;;  %v1439_v48 = vld [vmem:[%s1989_s8 + $0x18] sm:$0xff]   ;;  %v1440_v34 = vld [vmem:[%s1989_s8 + $0x20] sm:$0xff]  }
 0x662   :  { %1317 = vmatmul.mubr.msk.bf16.vlgmr.msra.gmra.mrb[0].mxu0 %vm232_vm2, %v521_v37  ;;  %v1443_v37 = vld [vmem:[%s1989_s8 + $0x38] sm:$0xff]  }
 0x663   :  { %1333 = vmatpush3.bf16.msra.mxu0 %v1422_v36  ;;  %1334 = vmatprep.mubr.msk.bf16.mxu0 %vm1616_vm1, %v1615_v29  ;;  %v1442_v36 = vld [vmem:[%s1989_s8 + $0x30] sm:$0xff]  }
 0x664   :  { %1344 = vmatprep.subr.bf16.mxu0 %v1615_v29 }
 0x66e   :  { %1335 = vmatmul.mubr.msk.bf16.vlgmr.msra.gmra.mrb[0].mxu0 %vm232_vm2, %v697_v22 }
 0x66f   :  { %1345 = vmatpush3.bf16.msra.mxu0 %v1861_v40  ;;  %1346 = vmatprep.mubr.msk.bf16.mxu0 %vm1616_vm1, %v1615_v29 }
 0x670   :  { %1350 = vmatprep.subr.bf16.mxu0 %v1615_v29 }
 0x6b9   :  { %v798_v50 = vpop.xlane.xlu1 %797 }
 0x6ba   :  { %v802_v38 = vsub.f32 %v790_v20, %v798_v50  ;;  %v952_v50 = vlaneseq }
 0x6bb   :  { %v801_v39 = vpop.xlane.xlu0 %800 }
 0x6bc   :  { %v804_v41 = vmul.f32 1.442695, %v802_v38  ;;  %v803_v42 = vsub.f32 %v793_v24, %v801_v39  ;;  %v953_v38 = vshrl.u32 %v952_v50, 7 }
 0x6be   :  { %1472 = vpow2.f32 %v804_v41  ;;  %v806_v43 = vmul.f32 1.442695, %v803_v42  ;;  %v954_v39 = vsub.s32 0, %v953_v38  ;;  %v950_v41 = vld [vmem:[%s1988_s7] sm:$0x3] }
 0x6c0   :  { %1474 = vpow2.f32 %v806_v43  ;;  %v955_v42 = vrot.slane %v950_v41, %v954_v39 }
 0x6c8   :  { %v1473_v44 = vpop.eup %1472 }
 0x6c9   :  { %v808_v45 = vsel %vm232_vm2, %v1473_v44, 0.0 }
 0x6ca   :  { %v1475_v46 = vpop.eup %1474  ;;  %809 = vadd.xlane.f32.xlu1 %v808_v45 }
 0x6cb   :  { %v811_v40 = vsel %vm232_vm2, %v1475_v46, 0.0  ;;  %v814_v47 = vpack.c.bf16 %v1475_v46, %v1473_v44 }
 0x6cc   :  { %812 = vadd.xlane.f32.xlu0 %v811_v40 }
 0x6cd   :  { %1347 = vmatmul.mubr.msk.bf16.vlgmr.msra.gmra.mrb[8].mxu0 %vm232_vm2, %v814_v47 }
 0x6ce   :  { %1352 = vmatprep.mubr.msk.bf16.mxu0 %vm1616_vm1, %v1615_v29  ;;  %1351 = vmatpush3.bf16.msra.mxu0 %v1423_v49 }
 0x6cf   :  { %1356 = vmatprep.subr.bf16.mxu0 %v1615_v29 }
 0x757   :  { %v810_v51 = vpop.xlane.xlu1 %809 }
 0x758   :  { %1476 = vrcp.f32 %v810_v51 }
 0x759   :  { %v813_v52 = vpop.xlane.xlu0 %812 }
 0x75a   :  { %1478 = vrcp.f32 %v813_v52 }
 0x762   :  { %v1477_v54 = vpop.eup %1476 }
 0x764   :  { %v1479_v56 = vpop.eup %1478 }
 0x7a0   :  { %v852_v53 = vpop.f32.mrb[8].mxu0 }
 0x7a1   :  { %v1348_v55 = vpop.f32.mrb[9].mxu0  ;;  %v861_v58 = vmul.f32 %v1477_v54, %v852_v53 }
 0x7a2   :  { %v855_v57 = vpop.f32.mrb[10].mxu0 }
 0x7a3   :  { %v862_v59 = vmul.f32 %v1479_v56, %v855_v57  ;;  %v1349_v60 = vpop.f32.mrb[11].mxu0 }
 0x7a5   :  { %v865_v11 = vpack.c.bf16 %v862_v59, %v861_v58  ;;  %v958_v59 = vsub.s32 1, %v953_v38 }
 0x7a7   :  { %1353 = vmatmul.mubr.msk.bf16.vlgmr.msra.gmra.mrb[0].mxu0 %vm232_vm2, %v865_v11  ;;  %v959_v60 = vrot.slane %v950_v41, %v958_v59 }
 0x7a8   :  { %1372 = vmatprep.mubr.msk.bf16.mxu0 %vm1616_vm1, %v1615_v29  ;;  %1357 = vmatpush3.bf16.msra.mxu0 %v1436_v31 }
 0x7a9   :  { %1358 = vmatprep.subr.bf16.mxu0 %v1615_v29 }
 0x7ac   :  { %1359 = vmatpush3.bf16.msra.mxu0 %v1437_v32 }
 0x7ad   :  { %1360 = vmatprep.subr.bf16.mxu0 %v1615_v29 }
 0x7b0   :  { %1361 = vmatpush3.bf16.msra.mxu0 %v1438_v33 }
 0x7b1   :  { %1362 = vmatprep.subr.bf16.mxu0 %v1615_v29 }
 0x7b4   :  { %1363 = vmatpush3.bf16.msra.mxu0 %v1439_v48 }
 0x7b5   :  { %1364 = vmatprep.subr.bf16.mxu0 %v1615_v29 }
 0x7b8   :  { %1365 = vmatpush3.bf16.msra.mxu0 %v1440_v34 }
 0x7b9   :  { %1366 = vmatprep.subr.bf16.mxu0 %v1615_v29 }
 0x7bc   :  { %1367 = vmatpush3.bf16.msra.mxu0 %v1441_v35 }
 0x7bd   :  { %1368 = vmatprep.subr.bf16.mxu0 %v1615_v29 }
 0x7c0   :  { %1369 = vmatpush3.bf16.msra.mxu0 %v1442_v36 }
 0x7c1   :  { %1370 = vmatprep.subr.bf16.mxu0 %v1615_v29 }
 0x7c4   :  { %1371 = vmatpush3.bf16.msra.mxu0 %v1443_v37 }
 0x87a   :  { %v909_v61 = vpop.f32.mrb[0].mxu0 }
 0x87b   :  { %v1908_v62 = vadd.f32 %v909_v61, %v1745_v0  ;;  %v1354_v63 = vpop.f32.mrb[1].mxu0  ;;  %v1426_v0 = vld [vmem:[#allocation8 + $0x4] ss:$8 sps:$4 sm:$0xff]  }
 0x87c   :  { %v912_v3 = vpop.f32.mrb[2].mxu0  ;;  %1005 = vmatprep.subr.bf16.mxu1 %v1426_v0 }
 0x87d   :  { %v1911_v2 = vadd.f32 %v912_v3, %v1747_v1  ;;  %v1355_v4 = vpop.f32.mrb[3].mxu0  ;;  %v918_v5 = vmul.f32 %v1908_v62, %v1908_v62  ;;  %1006 = vmatpush1.bf16.msra.mxu1 %v1424_v9  ;;  %v1427_v1 = vld [vmem:[#allocation8 + $0x10] ss:$8 sps:$4 sm:$0xff]  }
 0x87e   :  { %1007 = vmatprep.subr.bf16.mxu1 %v1429_v10 }
 0x87f   :  { %v920_v6 = vsel %vm96_vm0, %v918_v5, 0.0  ;;  %v919_v7 = vmul.f32 %v1911_v2, %v1911_v2 }
 0x880   :  { %921 = vadd.xlane.f32.xlu1 %v920_v6 }
 0x881   :  { %v923_v8 = vsel %vm96_vm0, %v919_v7, 0.0  ;;  %1008 = vmatpush1.bf16.msra.mxu1 %v1427_v1 }
 0x882   :  { %924 = vadd.xlane.f32.xlu0 %v923_v8  ;;  %1009 = vmatprep.subr.bf16.mxu1 %v1432_v12  ;;  %v1242_v12 = vld [vmem:[%s1990_s9] ss:$0 sm:$0xff] }
 0x885   :  { %1010 = vmatpush1.bf16.msra.mxu1 %v1430_v13 }
 0x886   :  { %1011 = vmatprep.subr.bf16.mxu1 %v1435_v14 }
 0x889   :  { %1012 = vmatpush1.bf16.msra.mxu1 %v1433_v15 }
 0x90d   :  { %v922_v16 = vpop.xlane.xlu1 %921 }
 0x90e   :  { %v926_v17 = vmul.f32 0.015625, %v922_v16 }
 0x90f   :  { %v925_v18 = vpop.xlane.xlu0 %924 }
 0x910   :  { %v928_v19 = vadd.f32 1e-06, %v926_v17  ;;  %v927_v20 = vmul.f32 0.015625, %v925_v18 }
 0x912   :  { %1480 = vrsqrt.f32 %v928_v19  ;;  %v929_v21 = vadd.f32 1e-06, %v927_v20 }
 0x914   :  { %1482 = vrsqrt.f32 %v929_v21 }
 0x91c   :  { %v1481_v22 = vpop.eup %1480 }
 0x91d   :  { %v932_v23 = vmul.f32 %v1481_v22, %v1908_v62 }
 0x91e   :  { %v1483_v24 = vpop.eup %1482 }
 0x91f   :  { %v933_v26 = vmul.f32 %v1483_v24, %v1911_v2  ;;  %v939_v27 = vmul.f32 %v1232_v25, %v932_v23 }
 0x921   :  { %v940_v28 = vmul.f32 %v1232_v25, %v933_v26 }
 0x923   :  { %v941_v30 = vpack.c.bf16 %v940_v28, %v939_v27 }
 0x925   :  { %1241 = vmatmul.mubr.msk.bf16.vlgmr.msra.gmra.mrb[28].mxu1 %vm96_vm0, %v941_v30 }
 0x9f8   :  { %v1039_v43 = vpop.f32.mrb[28].mxu1 }
 0x9f9   :  { %v1040_v44 = vadd.f32 %v1039_v43, %v955_v42  ;;  %v1041_v45 = vpop.f32.mrb[29].mxu1 }
 0x9fa   :  { %v1043_v46 = vpop.f32.mrb[30].mxu1  ;;  %v1042_v4 = vadd.f32 %v1041_v45, %v959_v60 }
 0x9fb   :  { %v1050_v40 = vmul.f32 0.044715, %v1040_v44  ;;  %v1044_v47 = vadd.f32 %v1043_v46, %v955_v42  ;;  %v1045_v29 = vpop.f32.mrb[31].mxu1  ;;  %v1048_v61 = vmul.f32 0.5, %v1040_v44 }
 0x9fc   :  { %v1046_v0 = vadd.f32 %v1045_v29, %v959_v60 }
 0x9fd   :  { %v1052_v49 = vmul.f32 %v1050_v40, %v1040_v44  ;;  %v1051_v51 = vmul.f32 0.044715, %v1044_v47  ;;  %v1049_v6 = vmul.f32 0.5, %v1044_v47 }
 0x9ff   :  { %v1054_v52 = vmul.f32 %v1052_v49, %v1040_v44  ;;  %v1053_v53 = vmul.f32 %v1051_v51, %v1044_v47 }
 0xa01   :  { %v1056_v54 = vadd.f32 %v1054_v52, %v1040_v44  ;;  %v1055_v55 = vmul.f32 %v1053_v53, %v1044_v47 }
 0xa03   :  { %v1058_v56 = vmul.f32 0.7978846, %v1056_v54  ;;  %v1057_v57 = vadd.f32 %v1055_v55, %v1044_v47 }
 0xa05   :  { %1484 = vtanh.f32 %v1058_v56  ;;  %v1059_v58 = vmul.f32 0.7978846, %v1057_v57 }
 0xa07   :  { %1486 = vtanh.f32 %v1059_v58 }
 0xa0f   :  { %v1485_v11 = vpop.eup %1484 }
 0xa10   :  { %v1062_v63 = vadd.f32 1.0, %v1485_v11 }
 0xa11   :  { %v1487_v3 = vpop.eup %1486 }
 0xa12   :  { %v1064_v5 = vmul.f32 %v1062_v63, %v1048_v61  ;;  %v1063_v7 = vadd.f32 1.0, %v1487_v3 }
 0xa14   :  { %v1066_v8 = vmul.f32 %v1064_v5, %v1042_v4  ;;  %v1065_v9 = vmul.f32 %v1063_v7, %v1049_v6 }
 0xa16   :  { %v1067_v10 = vmul.f32 %v1065_v9, %v1046_v0 }
 0xa18   :  { %v1068_v1 = vpack.c.bf16 %v1067_v10, %v1066_v8 }
 0xa1a   :  { %1373 = vmatmul.mubr.bf16.vlgmr.msra.gmra.mrb[12].mxu0 %v1068_v1 }
 0xaed   :  { %v1174_v13 = vpop.f32.mrb[12].mxu0 }
 0xaee   :  { %v1175_v14 = vadd.f32 %v1242_v12, %v1174_v13  ;;  %v1374_v15 = vpop.f32.mrb[13].mxu0 }
 0xaef   :  { %v1177_v16 = vpop.f32.mrb[14].mxu0 }
 0xaf0   :  { %v1181_v17 = vadd.f32 %v1908_v62, %v1175_v14  ;;  %v1178_v18 = vadd.f32 %v1242_v12, %v1177_v16  ;;  %v1375_v19 = vpop.f32.mrb[15].mxu0 }
 0xaf2   :  { %1183 = vst.msk [vmem:[#allocation10] sm:$0xff] %vm96_vm0, %v1181_v17  ;;  %v1182_v20 = vadd.f32 %v1911_v2, %v1178_v18 }
 0xaf4   :  { %1184 = vst.msk [vmem:[#allocation10 + $0x8] sm:$0xff] %vm96_vm0, %v1182_v20 }
 0xaf5   :  { %1587 = shalt.err (!%p1584_p8)
}
 0xaf6   :  { %s1588_s11 = scalar_lea.hbm %s1991_s10, 256 }
 0xaf7   :  { %p1589_p9 = scmp.ne.s32.totalorder %s1991_s10, %s1588_s11  ;;  %p1592_p10 = scmp.lt.u32.totalorder %s1588_s11, %s1991_s10 }
 0xaf9   :  { %p1594_p11 = pnand %p1592_p10, %p1589_p9 }
 0xafb   :  { %1597 = shalt.err (!%p1594_p11)
}
 0xafc   :  { %1196 = dma.vmem_to_hbm [thread:$0]  %s1191_s29, 256, %s1991_s10, [#allocation4], %s1608_s25, %s1608_s25, %s1609_s26  }
 0xafd   :  { %1604 = dma.done.wait [#allocation4], 256  }
 0xafe   :  { %1605 = vsyncadd [#allocation4], 4294967040 }
 0xaff   :  { %1200 = vsyncpa [#allocation3], 1 }
 0xb00   :  { %1201 = vsyncpa [#allocation6], 1 }
 0xb01   :  { %1202 = vsyncpa [#allocation9], 1 }
 0xb02   :  { %1203 = vsyncpa [#allocation4], 1 }

</bundles_post_ra>
